<compile_context>
chip_gen: v5e
topology: v5e:2x2
jax: 0.10.0
libtpu: 0.0.40
codegen_flags: <defaults>
</compile_context>

<pallas_src>
import functools

import jax
import jax.numpy as jnp
from jax.experimental import pallas as pl
from jax.experimental.pallas import tpu as pltpu


def _point_neck_kernel(zf_ref, xf_ref, w1_ref, b1_ref, w2t_ref, b2_ref,
                       wadj_ref, badj_ref, out_ref, *, hw_true):
    # zf_ref  : (Bb, C, Kz)  f32   template, flattened
    # xf_ref  : (Bb, C, HWp) bf16  search, flattened + lane-padded
    # w1_ref  : (Kz, Kz)     f32   fc1 weight, PyTorch (out, in) layout
    # b1_ref  : (Kz, 1)      f32   fc1 bias (column)
    # w2t_ref : (Kz, Kz)     f32   fc2 weight transposed, (in, out)
    # b2_ref  : (1, Kz)      f32   fc2 bias (row, lane-dense)
    # wadj_ref: (A, Kz)      f32   adjust-conv weight
    # badj_ref: (A, 1)       f32   adjust-conv bias (column)
    # out_ref : (Bb, A, HWp)
    zf = zf_ref[...]                                     # (Bb, C, Kz)  f32
    xf = xf_ref[...]                                     # (Bb, C, HWp) bf16

    # --- channel-attention input: avg-pool of corr folded onto xf ------------
    # Padding lanes are zero, so summing the padded row and dividing by the
    # true HW gives the exact mean.
    xmean = (jnp.sum(xf.astype(jnp.float32), axis=2, keepdims=True)
             * (1.0 / hw_true))                          # (Bb, C, 1)  f32
    # mean_HW(corr)[b, k] = sum_c zf[b, c, k] * mean_HW(xf)[b, c]
    avg = jnp.sum(zf * xmean, axis=1, keepdims=True)     # (Bb, 1, Kz) VPU + sublane reduce

    # --- CAModule MLP entirely on VPU/XLU (no M=1 MXU round-trips) -----------
    # fc1 + ReLU: y1[b, o] = sum_i W1[o, i] * avg[b, i] + b1[o]
    y1 = jnp.sum(w1_ref[...][None] * avg, axis=2, keepdims=True) + b1_ref[...][None]
    y1 = jnp.maximum(y1, 0.0)                            # (Bb, Kz, 1)
    # fc2 + sigmoid: y2[b, o] = sum_i W2t[i, o] * y1[b, i] + b2[o]
    y2 = jnp.sum(w2t_ref[...][None] * y1, axis=1, keepdims=True) + b2_ref[...][None]
    att = jax.nn.sigmoid(y2)                             # (Bb, 1, Kz)  f32

    # --- fuse attention + 1x1 adjust conv into one (A, C) weight per batch ---
    # out = Wadj @ (diag(att) @ zf^T @ xf) + badj = ((Wadj * att) @ zf^T) @ xf + badj
    w_scaled = (wadj_ref[...][None] * att).astype(jnp.bfloat16)   # (Bb, A, Kz)
    w_eff = jax.lax.dot_general(                                  # (Bb, A, C)  f32 acc
        w_scaled, zf.astype(jnp.bfloat16),
        dimension_numbers=(((2,), (2,)), ((0,), (0,))),
        preferred_element_type=jnp.float32)

    # --- one HW-wide MXU matmul; bf16 operands, f32 accumulation -------------
    out = jax.lax.dot_general(                                    # (Bb, A, HWp)
        w_eff.astype(jnp.bfloat16), xf,
        dimension_numbers=(((2,), (1,)), ((0,), (0,))),
        preferred_element_type=jnp.float32) + badj_ref[...][None]
    out_ref[...] = out.astype(out_ref.dtype)                      # lane-dense store


def point_neck_pallas(z, x, params, *, batch_block=1, out_dtype=jnp.float32):
    """z: (B, C, Hz, Wz), x: (B, C, H, W) -> (B, adj_channel, H, W)."""
    B, C, Hz, Wz = z.shape
    _, _, H, W = x.shape
    Kz = Hz * Wz
    HW = H * W
    assert B % batch_block == 0, "batch_block must divide B"
    Bb = batch_block

    w1, b1, w2, b2, wadj, badj = params
    A = wadj.shape[0]

    # Flatten spatial dims; cast the big search tensor to bf16 (halves DMA bytes).
    zf = z.reshape(B, C, Kz).astype(jnp.float32)            # (B, C, Kz) tiny -> keep f32
    xf = x.reshape(B, C, HW).astype(jnp.bfloat16)           # (B, C, HW)

    # Pad HW up to a multiple of 128 so the (A, HW) output stores stay
    # unmasked lane-dense vst (biggest measured store-path lever).
    HWp = ((HW + 127) // 128) * 128
    if HWp != HW:
        xf = jnp.pad(xf, ((0, 0), (0, 0), (0, HWp - HW)))

    # Parameter layouts chosen so the attention MLP runs as broadcast-mul +
    # reduce in-kernel:  fc1 keeps (out, in) (lane reduce), fc2 transposed
    # (sublane reduce -> row output that directly scales wadj's lanes).
    w1m = w1.astype(jnp.float32)                             # (Kz, Kz)
    b1c = b1.reshape(Kz, 1).astype(jnp.float32)              # (Kz, 1)
    w2t = jnp.transpose(w2).astype(jnp.float32)              # (Kz, Kz)
    b2r = b2.reshape(1, Kz).astype(jnp.float32)              # (1, Kz)
    wadjm = wadj.astype(jnp.float32)                         # (A, Kz)
    badjc = badj.reshape(A, 1).astype(jnp.float32)           # (A, 1)

    kernel = functools.partial(_point_neck_kernel, hw_true=float(HW))

    out_flat = pl.pallas_call(
        kernel,
        out_shape=jax.ShapeDtypeStruct((B, A, HWp), out_dtype),
        grid_spec=pltpu.PrefetchScalarGridSpec(
            num_scalar_prefetch=0,
            grid=(B // Bb,),
            in_specs=[
                pl.BlockSpec((Bb, C, Kz), lambda g: (g, 0, 0)),   # z (per batch block)
                pl.BlockSpec((Bb, C, HWp), lambda g: (g, 0, 0)),  # x (per batch block, bf16)
                pl.BlockSpec((Kz, Kz), lambda g: (0, 0)),         # fc1 weight
                pl.BlockSpec((Kz, 1), lambda g: (0, 0)),          # fc1 bias (column)
                pl.BlockSpec((Kz, Kz), lambda g: (0, 0)),         # fc2 weight (transposed)
                pl.BlockSpec((1, Kz), lambda g: (0, 0)),          # fc2 bias (row)
                pl.BlockSpec((A, Kz), lambda g: (0, 0)),          # adjust weight
                pl.BlockSpec((A, 1), lambda g: (0, 0)),           # adjust bias (column)
            ],
            out_specs=pl.BlockSpec((Bb, A, HWp), lambda g: (g, 0, 0)),
        ),
        compiler_params=pltpu.CompilerParams(
            dimension_semantics=("parallel",)),
    )(zf, xf, w1m, b1c, w2t, b2r, wadjm, badjc)

    if HWp != HW:
        out_flat = out_flat[:, :, :HW]
    return out_flat.reshape(B, A, H, W)


def point_neck_reference(z, x, params):
    """Pure-JAX f32 reference (mirrors the PyTorch forward, unfused)."""
    B, C, Hz, Wz = z.shape
    _, _, H, W = x.shape
    Kz, HW = Hz * Wz, H * W
    w1, b1, w2, b2, wadj, badj = params

    zt = jnp.transpose(z.reshape(B, C, Kz), (0, 2, 1))        # (B, Kz, C)
    xf = x.reshape(B, C, HW)                                  # (B, C, HW)
    corr = jnp.einsum('bkc,bcn->bkn', zt, xf)                 # (B, Kz, HW)
    avg = corr.mean(axis=2, keepdims=True)                    # (B, Kz, 1)
    y1 = jnp.maximum(jnp.einsum('ij,bjl->bil', w1, avg) + b1[None], 0.0)
    att = jax.nn.sigmoid(jnp.einsum('ij,bjl->bil', w2, y1) + b2[None])
    opt = corr * att
    out = jnp.einsum('aj,bjn->ban', wadj, opt) + badj[None]
    return out.reshape(B, -1, H, W)


if __name__ == "__main__":
    # Shapes consistent with Point_Neck(num_kernel=64, corr_channel=64,
    # adj_channel=128, matrix=True):
    B, C = 2, 16           # batch, feature channels
    Hz = Wz = 8            # template spatial -> Kz = 64 corr channels (num_kernel)
    H = W = 16             # search spatial   -> HW = 256 (already lane-dense)
    Kz = Hz * Wz
    A = 128                # adj_channel

    key = jax.random.PRNGKey(0)
    kz, kx, k1, k2, k3, k4, k5, k6 = jax.random.split(key, 8)

    z = jax.random.normal(kz, (B, C, Hz, Wz), dtype=jnp.float32)
    x = jax.random.normal(kx, (B, C, H, W), dtype=jnp.float32)

    # Parameters in PyTorch 1x1-conv layout: W (out, in), b (out, 1).
    w1 = jax.random.normal(k1, (Kz, Kz), dtype=jnp.float32) * 0.1
    b1 = jax.random.normal(k2, (Kz, 1), dtype=jnp.float32) * 0.1
    w2 = jax.random.normal(k3, (Kz, Kz), dtype=jnp.float32) * 0.1
    b2 = jax.random.normal(k4, (Kz, 1), dtype=jnp.float32) * 0.1
    wadj = jax.random.normal(k5, (A, Kz), dtype=jnp.float32) * 0.1
    badj = jax.random.normal(k6, (A, 1), dtype=jnp.float32) * 0.1
    params = (w1, b1, w2, b2, wadj, badj)

    ref = point_neck_reference(z, x, params)

    # batch_block=1: two "parallel" grid steps (keeps both v7x TensorCores busy).
    out_b1 = jax.block_until_ready(point_neck_pallas(z, x, params, batch_block=1))
    # batch_block=2: single grid step (amortizes per-step overhead on v5e/v6e).
    out_b2 = jax.block_until_ready(point_neck_pallas(z, x, params, batch_block=2))

    for out in (out_b1, out_b2):
        assert out.shape == (B, A, H, W)
        # bf16 matmul operands (f32 accumulation) -> ~1e-2-level relative slack.
        assert jnp.allclose(out, ref, atol=1e-1, rtol=2e-2), "mismatch vs JAX reference"

    print("KERNEL_OK")
</pallas_src>

<mosaic_0001>
module attributes {stable_mosaic.version = 11 : i64} {
  func.func @_point_neck_kernel(%arg0: i32, %arg1: memref<1x16x64xf32, #tpu.memory_space<vmem>>, %arg2: memref<1x16x256xbf16, #tpu.memory_space<vmem>>, %arg3: memref<64x64xf32, #tpu.memory_space<vmem>>, %arg4: memref<64x1xf32, #tpu.memory_space<vmem>>, %arg5: memref<64x64xf32, #tpu.memory_space<vmem>>, %arg6: memref<1x64xf32, #tpu.memory_space<vmem>>, %arg7: memref<128x64xf32, #tpu.memory_space<vmem>>, %arg8: memref<128x1xf32, #tpu.memory_space<vmem>>, %arg9: memref<1x128x256xf32, #tpu.memory_space<vmem>>) attributes {dimension_semantics = [#tpu.dimension_semantics<parallel>], iteration_bounds = array<i64: 2>, scalar_prefetch = 0 : i64, scratch_operands = 0 : i64, tpu.core_type = #tpu.core_type<tc>, window_params = [{transform_indices = @transform_0, window_bounds = array<i64: 1, 16, 64>}, {transform_indices = @transform_1, window_bounds = array<i64: 1, 16, 256>}, {pipeline_mode = #tpu.pipeline_mode<synchronous>, transform_indices = @transform_2, window_bounds = array<i64: 64, 64>}, {pipeline_mode = #tpu.pipeline_mode<synchronous>, transform_indices = @transform_3, window_bounds = array<i64: 64, 1>}, {pipeline_mode = #tpu.pipeline_mode<synchronous>, transform_indices = @transform_4, window_bounds = array<i64: 64, 64>}, {pipeline_mode = #tpu.pipeline_mode<synchronous>, transform_indices = @transform_5, window_bounds = array<i64: 1, 64>}, {pipeline_mode = #tpu.pipeline_mode<synchronous>, transform_indices = @transform_6, window_bounds = array<i64: 128, 64>}, {pipeline_mode = #tpu.pipeline_mode<synchronous>, transform_indices = @transform_7, window_bounds = array<i64: 128, 1>}, {transform_indices = @transform_8, window_bounds = array<i64: 1, 128, 256>}]} {
    %c0 = arith.constant 0 : index
    %c0_0 = arith.constant 0 : index
    %c0_1 = arith.constant 0 : index
    %0 = vector.load %arg1[%c0, %c0_0, %c0_1] : memref<1x16x64xf32, #tpu.memory_space<vmem>>, vector<1x16x64xf32>
    %c0_2 = arith.constant 0 : index
    %c0_3 = arith.constant 0 : index
    %c0_4 = arith.constant 0 : index
    %1 = vector.load %arg2[%c0_2, %c0_3, %c0_4] : memref<1x16x256xbf16, #tpu.memory_space<vmem>>, vector<1x16x256xbf16>
    %2 = arith.extf %1 : vector<1x16x256xbf16> to vector<1x16x256xf32>
    %cst = arith.constant dense<0.000000e+00> : vector<1x16xf32>
    %3 = vector.multi_reduction <add>, %2, %cst [2] : vector<1x16x256xf32> to vector<1x16xf32>
    %4 = vector.shape_cast %3 : vector<1x16xf32> to vector<1x16x1xf32>
    %cst_5 = arith.constant 3.906250e-03 : f32
    %5 = vector.broadcast %cst_5 : f32 to vector<1x16x1xf32>
    %6 = arith.mulf %4, %5 : vector<1x16x1xf32>
    %7 = vector.broadcast %6 : vector<1x16x1xf32> to vector<1x16x64xf32>
    %8 = arith.mulf %0, %7 : vector<1x16x64xf32>
    %cst_6 = arith.constant dense<0.000000e+00> : vector<1x64xf32>
    %9 = vector.multi_reduction <add>, %8, %cst_6 [1] : vector<1x16x64xf32> to vector<1x64xf32>
    %10 = vector.shape_cast %9 : vector<1x64xf32> to vector<1x1x64xf32>
    %c0_7 = arith.constant 0 : index
    %c0_8 = arith.constant 0 : index
    %11 = vector.load %arg3[%c0_7, %c0_8] : memref<64x64xf32, #tpu.memory_space<vmem>>, vector<64x64xf32>
    %12 = vector.shape_cast %11 : vector<64x64xf32> to vector<1x64x64xf32>
    %13 = vector.broadcast %10 : vector<1x1x64xf32> to vector<1x64x64xf32>
    %14 = arith.mulf %12, %13 : vector<1x64x64xf32>
    %cst_9 = arith.constant dense<0.000000e+00> : vector<1x64xf32>
    %15 = vector.multi_reduction <add>, %14, %cst_9 [2] : vector<1x64x64xf32> to vector<1x64xf32>
    %16 = vector.shape_cast %15 : vector<1x64xf32> to vector<1x64x1xf32>
    %c0_10 = arith.constant 0 : index
    %c0_11 = arith.constant 0 : index
    %17 = vector.load %arg4[%c0_10, %c0_11] : memref<64x1xf32, #tpu.memory_space<vmem>>, vector<64x1xf32>
    %18 = vector.shape_cast %17 : vector<64x1xf32> to vector<1x64x1xf32>
    %19 = arith.addf %16, %18 : vector<1x64x1xf32>
    %cst_12 = arith.constant 0.000000e+00 : f32
    %20 = vector.broadcast %cst_12 : f32 to vector<1x64x1xf32>
    %21 = arith.maximumf %19, %20 : vector<1x64x1xf32>
    %c0_13 = arith.constant 0 : index
    %c0_14 = arith.constant 0 : index
    %22 = vector.load %arg5[%c0_13, %c0_14] : memref<64x64xf32, #tpu.memory_space<vmem>>, vector<64x64xf32>
    %23 = vector.shape_cast %22 : vector<64x64xf32> to vector<1x64x64xf32>
    %24 = vector.broadcast %21 : vector<1x64x1xf32> to vector<1x64x64xf32>
    %25 = arith.mulf %23, %24 : vector<1x64x64xf32>
    %cst_15 = arith.constant dense<0.000000e+00> : vector<1x64xf32>
    %26 = vector.multi_reduction <add>, %25, %cst_15 [1] : vector<1x64x64xf32> to vector<1x64xf32>
    %27 = vector.shape_cast %26 : vector<1x64xf32> to vector<1x1x64xf32>
    %c0_16 = arith.constant 0 : index
    %c0_17 = arith.constant 0 : index
    %28 = vector.load %arg6[%c0_16, %c0_17] : memref<1x64xf32, #tpu.memory_space<vmem>>, vector<1x64xf32>
    %29 = vector.shape_cast %28 : vector<1x64xf32> to vector<1x1x64xf32>
    %30 = arith.addf %27, %29 : vector<1x1x64xf32>
    %31 = arith.negf %30 : vector<1x1x64xf32>
    %32 = math.exp %31 : vector<1x1x64xf32>
    %cst_18 = arith.constant 1.000000e+00 : f32
    %33 = vector.broadcast %cst_18 : f32 to vector<1x1x64xf32>
    %34 = arith.addf %33, %32 : vector<1x1x64xf32>
    %35 = arith.divf %33, %34 : vector<1x1x64xf32>
    %c0_19 = arith.constant 0 : index
    %c0_20 = arith.constant 0 : index
    %36 = vector.load %arg7[%c0_19, %c0_20] : memref<128x64xf32, #tpu.memory_space<vmem>>, vector<128x64xf32>
    %37 = vector.shape_cast %36 : vector<128x64xf32> to vector<1x128x64xf32>
    %38 = vector.broadcast %35 : vector<1x1x64xf32> to vector<1x128x64xf32>
    %39 = arith.mulf %37, %38 : vector<1x128x64xf32>
    %40 = arith.truncf %39 : vector<1x128x64xf32> to vector<1x128x64xbf16>
    %41 = arith.truncf %0 : vector<1x16x64xf32> to vector<1x16x64xbf16>
    %cst_21 = arith.constant dense<0.000000e+00> : vector<1x128x16xf32>
    %42 = tpu.matmul %40, %41, %cst_21 {dimension_numbers = #tpu.dot_dimension_numbers<[2], [2], [1], [1], [0, 0, 0, 1, 1, 1], [0], [0]>} : vector<1x128x64xbf16>, vector<1x16x64xbf16>, vector<1x128x16xf32> -> vector<1x128x16xf32>
    %43 = arith.truncf %42 : vector<1x128x16xf32> to vector<1x128x16xbf16>
    %cst_22 = arith.constant dense<0.000000e+00> : vector<1x128x256xf32>
    %44 = tpu.matmul %43, %1, %cst_22 {dimension_numbers = #tpu.dot_dimension_numbers<[2], [1], [1], [2], [0, 0, 0, 1, 1, 2], [0], [0]>} : vector<1x128x16xbf16>, vector<1x16x256xbf16>, vector<1x128x256xf32> -> vector<1x128x256xf32>
    %c0_23 = arith.constant 0 : index
    %c0_24 = arith.constant 0 : index
    %45 = vector.load %arg8[%c0_23, %c0_24] : memref<128x1xf32, #tpu.memory_space<vmem>>, vector<128x1xf32>
    %46 = vector.shape_cast %45 : vector<128x1xf32> to vector<1x128x1xf32>
    %47 = vector.broadcast %46 : vector<1x128x1xf32> to vector<1x128x256xf32>
    %48 = arith.addf %44, %47 : vector<1x128x256xf32>
    %c0_25 = arith.constant 0 : index
    %c0_26 = arith.constant 0 : index
    %c0_27 = arith.constant 0 : index
    %49 = vector.load %arg9[%c0_25, %c0_26, %c0_27] : memref<1x128x256xf32, #tpu.memory_space<vmem>>, vector<1x128x256xf32>
    tpu.vector_store %arg9[%c0_25, %c0_26, %c0_27], %48 {strides = array<i32>} : memref<1x128x256xf32, #tpu.memory_space<vmem>>, vector<1x128x256xf32>,
    return
  }
  func.func @transform_0(%arg0: i32) -> (i32, i32, i32) {
    %c0_i32 = arith.constant 0 : i32
    %c0_i32_0 = arith.constant 0 : i32
    %c0_i32_1 = arith.constant 0 : i32
    return %arg0, %c0_i32, %c0_i32_0 : i32, i32, i32
  }
  func.func @transform_1(%arg0: i32) -> (i32, i32, i32) {
    %c0_i32 = arith.constant 0 : i32
    %c0_i32_0 = arith.constant 0 : i32
    %c0_i32_1 = arith.constant 0 : i32
    return %arg0, %c0_i32, %c0_i32_0 : i32, i32, i32
  }
  func.func @transform_2(%arg0: i32) -> (i32, i32) {
    %c0_i32 = arith.constant 0 : i32
    %c0_i32_0 = arith.constant 0 : i32
    %c0_i32_1 = arith.constant 0 : i32
    return %c0_i32, %c0_i32_0 : i32, i32
  }
  func.func @transform_3(%arg0: i32) -> (i32, i32) {
    %c0_i32 = arith.constant 0 : i32
    %c0_i32_0 = arith.constant 0 : i32
    %c0_i32_1 = arith.constant 0 : i32
    return %c0_i32, %c0_i32_0 : i32, i32
  }
  func.func @transform_4(%arg0: i32) -> (i32, i32) {
    %c0_i32 = arith.constant 0 : i32
    %c0_i32_0 = arith.constant 0 : i32
    %c0_i32_1 = arith.constant 0 : i32
    return %c0_i32, %c0_i32_0 : i32, i32
  }
  func.func @transform_5(%arg0: i32) -> (i32, i32) {
    %c0_i32 = arith.constant 0 : i32
    %c0_i32_0 = arith.constant 0 : i32
    %c0_i32_1 = arith.constant 0 : i32
    return %c0_i32, %c0_i32_0 : i32, i32
  }
  func.func @transform_6(%arg0: i32) -> (i32, i32) {
    %c0_i32 = arith.constant 0 : i32
    %c0_i32_0 = arith.constant 0 : i32
    %c0_i32_1 = arith.constant 0 : i32
    return %c0_i32, %c0_i32_0 : i32, i32
  }
  func.func @transform_7(%arg0: i32) -> (i32, i32) {
    %c0_i32 = arith.constant 0 : i32
    %c0_i32_0 = arith.constant 0 : i32
    %c0_i32_1 = arith.constant 0 : i32
    return %c0_i32, %c0_i32_0 : i32, i32
  }
  func.func @transform_8(%arg0: i32) -> (i32, i32, i32) {
    %c0_i32 = arith.constant 0 : i32
    %c0_i32_0 = arith.constant 0 : i32
    %c0_i32_1 = arith.constant 0 : i32
    return %arg0, %c0_i32, %c0_i32_0 : i32, i32, i32
  }
}

</mosaic_0001>

<bundles_post_ra>
// kernel: tpu_custom_call.1
= control target key start
LH: loop header
LB: loop body
LE: loop exit
PB: predicated region body
PF: predicated region fallthrough
CT: control target
= control target key end

     0   :  { %13 = vsyncpa [#allocation3], 0  ;;  %s1703_s0 = inlined_call_operand.vmem [shape: f32[2,16,64], index: 0, kind: input, shape index: {}]   ;;  %s1704_s1 = inlined_call_operand.vmem [shape: bf16[2,16,256], index: 1, kind: input, shape index: {}]   ;;  %s1705_s2 = inlined_call_operand.vmem [shape: f32[64,64], index: 2, kind: input, shape index: {}]   ;;  %s1706_s3 = inlined_call_operand.vmem [shape: f32[64,1], index: 3, kind: input, shape index: {}]   ;;  %s1707_s4 = inlined_call_operand.vmem [shape: f32[64,64], index: 4, kind: input, shape index: {}]   ;;  %s1708_s5 = inlined_call_operand.vmem [shape: f32[1,64], index: 5, kind: input, shape index: {}]   ;;  %s1709_s6 = inlined_call_operand.vmem [shape: f32[128,64], index: 6, kind: input, shape index: {}]   ;;  %s1710_s7 = inlined_call_operand.vmem [shape: f32[128,1], index: 7, kind: input, shape index: {}]   ;;  %s1711_s8 = inlined_call_operand.hbm [shape: f32[2,128,256], index: 8, kind: output, shape index: {}]  }
   0x1   :  { %15 = vsyncpa [#allocation3 + $0x1], 0  ;;  %s1310_s27 = smov 0   ;;  %s1312_s28 = smov 0  }
   0x2   :  { %s1314_s29 = smov 0   ;;  %s1316_s30 = smov 0  }
   0x3 LB: > { %s1331_s9 = sadd.s32 4294967295, %s1260_s30   ;;  %s1094_s10 = sadd.s32 4294967294, %s1260_s30   ;;  %s1260_s30 = sphi %s1316_s30, %s1717_s30   ;;  %s1256_s29 = sphi %s1314_s29, %s1716_s29   ;;  %s1252_s28 = sphi %s1312_s28, %s1715_s28   ;;  %s1248_s27 = sphi %s1310_s27, %s1714_s27  }
   0x4   : > { %s1335_s11 = sadd.s32 1, %s1260_s30   ;;  %s206_s12 = sadd.s32 1, %s1256_s29 }
   0x5   : > { %s203_s13 = ssub.s32 %s1260_s30, %s1335_s11  ;;  %p216_p0 = scmp.ne.s32.totalorder %s1256_s29, %s1252_s28 }
   0x6   : > { %p204_p1 = scmp.eq.s32.totalorder %s203_s13, 0  ;;  %p217_p2 = scmp.eq.s32.totalorder %s1331_s9, 1 }
   0x7   : > { %p222_p3 = scmp.ne.s32.totalorder %s1252_s28, %s1248_s27  ;;  %p223_p4 = scmp.eq.s32.totalorder %s1094_s10, 1 }
   0x8   : > { %s1346_s14 = scalar_select %p204_p1, %s1256_s29, %s206_s12  }
   0x9   : > { %p1348_p5 = por %p217_p2, %p216_p0  ;;  %p1352_p6 = por %p223_p4, %p222_p3 }
   0xa   : > { %p1097_p7 = scmp.ge.s32.totalorder %s1260_s30, 1  ;;  %p275_p8 = scmp.lt.s32.totalorder %s1260_s30, 3 }
   0xc   : > { %p276_p9 = pnand %p1097_p7, %p275_p8 }
   0xd   : > { %p314_p10 = scmp.lt.s32.totalorder (!%p276_p9), %s1331_s9, 1  ;;  %s1145_s20 = sshll.u32 (!%p276_p9), %s1331_s9, 8 }
   0xe   : > { %279 = sbr.rel (%p276_p9) target bundleno = 867 (0x363), region = 52 }
  0x13   : > { %s315_s17 = scalar_select %p314_p10, %s1331_s9, 1  ;;  %vm343_vm0 = vcmask 523264   ;;  %v357_v24 = vld [vmem:[%s1705_s2 + $0x20] sm:$0xff]  ;;  %v355_v25 = vld [vmem:[%s1705_s2 + $0x10] sm:$0xff]  ;;  %v360_v34 = vld [vmem:[%s1705_s2 + $0x38] sm:$0xff]  ;;  %v1262_v49 = vmov 0  }
  0x14   : > { %v353_v26 = vld [vmem:[%s1705_s2] sm:$0xff]  ;;  %v356_v35 = vld [vmem:[%s1705_s2 + $0x18] sm:$0xff]  ;;  %v354_v36 = vld [vmem:[%s1705_s2 + $0x8] sm:$0xff]  ;;  %1193 = vset.pattern.permute.xlu0 %v1262_v49  ;;  %1191 = vset.pattern.permute.xlu1 %v1262_v49  ;;  %vm849_vm5 = vcmask 130048  }
  0x15   : > { %s1141_s18 = sshll.u32 %s315_s17, 4  ;;  %v359_v43 = vld [vmem:[%s1705_s2 + $0x30] sm:$0xff]  ;;  %v358_v44 = vld [vmem:[%s1705_s2 + $0x28] sm:$0xff]  ;;  %1192 = vset.pattern.permute.xlu2 %v1262_v49  ;;  %v393_v51 = vld [vmem:[%s1706_s3] sm:$0xff] }
  0x16   : > { %s1363_s21 = scalar_lea.vmem %s1704_s1, %s1141_s18  ;;  %s318_s24 = scalar_lea.vmem %s1703_s0, %s1141_s18  ;;  %v395_v50 = vld [vmem:[%s1706_s3 + $0x10] sm:$0xff]  ;;  %v397_v58 = vld [vmem:[%s1706_s3 + $0x20] sm:$0xff]  ;;  %v394_v60 = vld [vmem:[%s1706_s3 + $0x8] sm:$0xff] }
  0x17   : > { %v327_v0 = vld [vmem:[%s1363_s21] sm:$0xff]  ;;  %v328_v3 = vld [vmem:[%s1363_s21 + $0x8] sm:$0xff] }
  0x18   : > { %v329_v1 = vunpack.c.l.bf16 %v327_v0  ;;  %v330_v2 = vunpack.c.h.bf16 %v327_v0  ;;  %v331_v5 = vunpack.c.l.bf16 %v328_v3  ;;  %v332_v6 = vunpack.c.h.bf16 %v328_v3  ;;  %v1370_v10 = vld [vmem:[%s318_s24] sm:$0xff]  ;;  %v1372_v12 = vld [vmem:[%s318_s24 + $0x8] sm:$0xff]  ;;  %s1016_s24 = scalar_lea.hbm %s1711_s8, %s1145_s20 }
  0x19   : > { %s1019_s26 = sshll.u32 %s1016_s24, 4  ;;  %s1020_s26 = int_to_ptr.hbm [resolvable:$true] %s1019_s26 }
  0x1a   : > { %v333_v4 = vadd.f32 %v330_v2, %v329_v1  ;;  %v336_v7 = vadd.f32 %v332_v6, %v331_v5  ;;  %v704_v1 = vld [vmem:[%s1710_s7 + $0x8] sm:$0xff]  ;;  %v399_v5 = vld [vmem:[%s1706_s3 + $0x30] sm:$0xff]  ;;  %s1212_s10 = sshra.s32 %s1020_s26, 4  ;;  %s1213_s10 = int_to_ptr.hbm [resolvable:$true] %s1212_s10 }
  0x1b   : > { %s1214_s12 = scalar_lea.hbm %s1213_s10, 256  ;;  %p1219_p0 = scmp.lt.s32.totalorder %s1213_s10, %s1711_s8 }
  0x1c   : > { %334 = vadd.xlane.f32.xlu0 %v333_v4  ;;  %v396_v4 = vld [vmem:[%s1706_s3 + $0x18] sm:$0xff]  ;;  %p1215_p11 = scmp.ne.s32.totalorder %s1213_s10, %s1214_s12 }
  0x1e   : > { %p1216_p12 = pnand %p1215_p11, %p1348_p5 }
  0x20   : > { %p1217_p13 = pneg %p1216_p12 }
  0x24   : > { %337 = vadd.xlane.f32.xlu0 %v336_v7 }
  0x8f   : > { %v335_v8 = vpop.xlane.xlu0 %334 }
  0x90   : > { %v339_v9 = vmul.f32 0.00390625, %v335_v8 }
  0x92   : > { %v341_v13 = vmul.f32 %v339_v9, %v1370_v10  ;;  %v707_v9 = vld [vmem:[%s1710_s7 + $0x20] sm:$0xff] }
  0x94   : > { %v344_v16 = vsel %vm343_vm0, %v341_v13, 0.0 }
  0x97   : > { %v338_v11 = vpop.xlane.xlu0 %337 }
  0x98   : > { %v340_v14 = vmul.f32 0.00390625, %v338_v11 }
  0x9a   : > { %v342_v15 = vmul.f32 %v340_v14, %v1372_v12  ;;  %v398_v14 = vld [vmem:[%s1706_s3 + $0x28] sm:$0xff] }
  0x9c   : > { %v345_v17 = vsel %vm343_vm0, %v342_v15, 0.0 }
  0x9d   : > { %v346_v18 = vadd.f32 %v345_v17, %v344_v16  ;;  %v710_v17 = vld [vmem:[%s1710_s7 + $0x38] sm:$0xff] }
  0x9f   : > { %v347_v19 = vrot.slane %v346_v18, 4 }
  0xa1   : > { %v348_v20 = vadd.f32 %v347_v19, %v346_v18  ;;  %v703_v18 = vld [vmem:[%s1710_s7] sm:$0xff] }
  0xa3   : > { %v349_v21 = vrot.slane %v348_v20, 2 }
  0xa5   : > { %v350_v22 = vadd.f32 %v349_v21, %v348_v20  ;;  %v400_v20 = vld [vmem:[%s1706_s3 + $0x38] sm:$0xff] }
  0xa7   : > { %v351_v23 = vrot.slane %v350_v22, 1 }
  0xa9   : > { %v352_v27 = vadd.f32 %v351_v23, %v350_v22  ;;  %v713_v23 = vld [vmem:[%s1710_s7 + $0x50] sm:$0xff] }
  0xab   : > { %v365_v28 = vmul.f32 %v357_v24, %v352_v27  ;;  %v363_v29 = vmul.f32 %v355_v25, %v352_v27  ;;  %v361_v30 = vmul.f32 %v353_v26, %v352_v27  ;;  %v368_v37 = vmul.f32 %v360_v34, %v352_v27  ;;  %v706_v24 = vld [vmem:[%s1710_s7 + $0x18] sm:$0xff]  ;;  %v716_v26 = vld [vmem:[%s1710_s7 + $0x68] sm:$0xff] }
  0xac   : > { %v364_v38 = vmul.f32 %v356_v35, %v352_v27  ;;  %v362_v39 = vmul.f32 %v354_v36, %v352_v27  ;;  %v367_v45 = vmul.f32 %v359_v43, %v352_v27  ;;  %v366_v46 = vmul.f32 %v358_v44, %v352_v27  ;;  %v709_v27 = vld [vmem:[%s1710_s7 + $0x30] sm:$0xff]  ;;  %v714_v34 = vld [vmem:[%s1710_s7 + $0x58] sm:$0xff] }
  0xad   : > { %v381_v31 = vsel %vm343_vm0, %v365_v28, 0.0  ;;  %v375_v32 = vsel %vm343_vm0, %v363_v29, 0.0  ;;  %v369_v33 = vsel %vm343_vm0, %v361_v30, 0.0  ;;  %v390_v40 = vsel %vm343_vm0, %v368_v37, 0.0  ;;  %v705_v28 = vld [vmem:[%s1710_s7 + $0x10] sm:$0xff]  ;;  %v712_v29 = vld [vmem:[%s1710_s7 + $0x48] sm:$0xff] }
  0xae   : > { %382 = vadd.xlane.f32.xlu0 %v381_v31  ;;  %376 = vadd.xlane.f32.xlu2 %v375_v32  ;;  %v378_v41 = vsel %vm343_vm0, %v364_v38, 0.0  ;;  %v372_v42 = vsel %vm343_vm0, %v362_v39, 0.0  ;;  %v387_v47 = vsel %vm343_vm0, %v367_v45, 0.0  ;;  %v384_v48 = vsel %vm343_vm0, %v366_v46, 0.0  ;;  %v708_v30 = vld [vmem:[%s1710_s7 + $0x28] sm:$0xff]  ;;  %v715_v31 = vld [vmem:[%s1710_s7 + $0x60] sm:$0xff] }
  0xaf   : > { %370 = vadd.xlane.f32.xlu1 %v369_v33  ;;  %v711_v32 = vld [vmem:[%s1710_s7 + $0x40] sm:$0xff]  ;;  %v718_v33 = vld [vmem:[%s1710_s7 + $0x78] sm:$0xff]  ;;  %v717_v35 = vld [vmem:[%s1710_s7 + $0x70] sm:$0xff] }
  0xb0   : > { %v418_v38 = vld [vmem:[%s1707_s4 + $0x8] sm:$0xff]  ;;  %v417_v39 = vld [vmem:[%s1707_s4] sm:$0xff] }
  0xb6   : > { %391 = vadd.xlane.f32.xlu0 %v390_v40  ;;  %379 = vadd.xlane.f32.xlu2 %v378_v41  ;;  %v419_v41 = vld [vmem:[%s1707_s4 + $0x10] sm:$0xff] }
  0xb7   : > { %373 = vadd.xlane.f32.xlu1 %v372_v42 }
  0xbe   : > { %388 = vadd.xlane.f32.xlu2 %v387_v47 }
  0xbf   : > { %385 = vadd.xlane.f32.xlu1 %v384_v48  ;;  %v420_v48 = vld [vmem:[%s1707_s4 + $0x18] sm:$0xff] }
 0x121   : > { %v377_v52 = vpop.xlane.xlu2 %376  ;;  %v383_v59 = vpop.xlane.xlu0 %382 }
 0x122   : > { %v403_v53 = vadd.f32 %v395_v50, %v377_v52  ;;  %v371_v54 = vpop.xlane.xlu1 %370  ;;  %v405_v61 = vadd.f32 %v397_v58, %v383_v59 }
 0x123   : > { %v401_v55 = vadd.f32 %v393_v51, %v371_v54  ;;  %v421_v51 = vld [vmem:[%s1707_s4 + $0x20] sm:$0xff] }
 0x124   : > { %v411_v56 = vmax.f32 %v403_v53, 0.0  ;;  %v413_v2 = vmax.f32 %v405_v61, 0.0 }
 0x125   : > { %v409_v57 = vmax.f32 %v401_v55, 0.0 }
 0x126   : > { %437 = vperm.xlu0 %1193, %v411_v56  }
 0x127   : > { %427 = vperm.xlu1 %1191, %v409_v57   ;;  %v422_v57 = vld [vmem:[%s1707_s4 + $0x28] sm:$0xff] }
 0x129   : > { %v380_v62 = vpop.xlane.xlu2 %379  ;;  %v392_v21 = vpop.xlane.xlu0 %391 }
 0x12a   : > { %v374_v63 = vpop.xlane.xlu1 %373  ;;  %v404_v6 = vadd.f32 %v396_v4, %v380_v62  ;;  %v408_v22 = vadd.f32 %v400_v20, %v392_v21  ;;  %v424_v62 = vld [vmem:[%s1707_s4 + $0x38] sm:$0xff] }
 0x12b   : > { %v402_v0 = vadd.f32 %v394_v60, %v374_v63 }
 0x12c   : > { %v412_v13 = vmax.f32 %v404_v6, 0.0  ;;  %v416_v25 = vmax.f32 %v408_v22, 0.0  ;;  %v494_v22 = vld [vmem:[%s1708_s5] sm:$0x1] }
 0x12d   : > { %v410_v3 = vmax.f32 %v402_v0, 0.0 }
 0x12e   : > { %726 = vperm.xlu0 %1193, %v704_v1   ;;  %v423_v1 = vld [vmem:[%s1707_s4 + $0x30] sm:$0xff] }
 0x12f   : > { %447 = vperm.xlu1 %1191, %v413_v2   ;;  %432 = vperm.xlu2 %1192, %v410_v3  }
 0x131   : > { %v389_v7 = vpop.xlane.xlu2 %388 }
 0x132   : > { %v407_v8 = vadd.f32 %v399_v5, %v389_v7  ;;  %v386_v15 = vpop.xlane.xlu1 %385 }
 0x133   : > { %v406_v16 = vadd.f32 %v398_v14, %v386_v15  ;;  %v564_v15 = vpack.c.bf16 %v1370_v10, %v1370_v10 }
 0x134   : > { %v415_v11 = vmax.f32 %v407_v8, 0.0 }
 0x135   : > { %v414_v19 = vmax.f32 %v406_v16, 0.0  ;;  %v565_v16 = vpack.c.bf16 %v1372_v12, %v1372_v12  ;;  %v608_v20 = vunpack.c.l.b16 %v564_v15 }
 0x136   : > { %741 = vperm.xlu0 %1193, %v707_v9  }
 0x137   : > { %457 = vperm.xlu1 %1191, %v415_v11   ;;  %442 = vperm.xlu2 %1192, %v412_v13   ;;  %v609_v21 = vunpack.c.l.b16 %v565_v16 }
 0x13e   : > { %756 = vperm.xlu0 %1193, %v710_v17  }
 0x13f   : > { %721 = vperm.xlu1 %1191, %v703_v18   ;;  %452 = vperm.xlu2 %1192, %v414_v19  }
 0x146   : > { %771 = vperm.xlu0 %1193, %v713_v23  }
 0x147   : > { %736 = vperm.xlu1 %1191, %v706_v24   ;;  %462 = vperm.xlu2 %1192, %v416_v25   ;;  %v610_v24 = vpack.c.b16 %v609_v21, %v608_v20 }
 0x14e   : > { %786 = vperm.xlu0 %1193, %v716_v26   ;;  %v636_v26 = vsel %vm343_vm0, %v610_v24, 0 }
 0x14f   : > { %751 = vperm.xlu1 %1191, %v709_v27   ;;  %731 = vperm.xlu2 %1192, %v705_v28  }
 0x150   : > { %645 = vmatpush.bf16.xpose.msra.mxu0 %v636_v26  ;;  %1146 = vmatpush.bf16.xpose.msra.mxu3 %v636_v26 }
 0x157   : > { %766 = vperm.xlu1 %1191, %v712_v29   ;;  %746 = vperm.xlu2 %1192, %v708_v30  }
 0x15f   : > { %781 = vperm.xlu1 %1191, %v715_v31   ;;  %761 = vperm.xlu2 %1192, %v711_v32  }
 0x167   : > { %796 = vperm.xlu1 %1191, %v718_v33   ;;  %776 = vperm.xlu2 %1192, %v714_v34  }
 0x16f   : > { %791 = vperm.xlu2 %1192, %v717_v35  }
 0x189   : > { %v433_v36 = vpop.permute.xlu2 %432 }
 0x18a   : > { %v466_v40 = vmul.f32 %v433_v36, %v418_v38 }
 0x18c   : > { %v474_v45 = vsel %vm343_vm0, %v466_v40, 0.0  ;;  %v527_v40 = vld [vmem:[%s1709_s6 + $0x60] sm:$0xff] }
 0x191   : > { %v443_v37 = vpop.permute.xlu2 %442 }
 0x192   : > { %v468_v52 = vmul.f32 %v443_v37, %v420_v48  ;;  %v515_v37 = vld [vmem:[%s1709_s6] sm:$0xff] }
 0x194   : > { %v478_v58 = vsel %vm343_vm0, %v468_v52, 0.0 }
 0x198   : > { %v438_v42 = vpop.permute.xlu0 %437 }
 0x199   : > { %v428_v43 = vpop.permute.xlu1 %427  ;;  %v467_v46 = vmul.f32 %v438_v42, %v419_v41  ;;  %v453_v49 = vpop.permute.xlu2 %452  ;;  %v528_v41 = vld [vmem:[%s1709_s6 + $0x68] sm:$0xff] }
 0x19a   : > { %v465_v44 = vmul.f32 %v428_v43, %v417_v39  ;;  %v470_v61 = vmul.f32 %v453_v49, %v422_v57  ;;  %v516_v39 = vld [vmem:[%s1709_s6 + $0x8] sm:$0xff]  ;;  %v517_v57 = vld [vmem:[%s1709_s6 + $0x10] sm:$0xff] }
 0x19b   : > { %v476_v53 = vsel %vm343_vm0, %v467_v46, 0.0 }
 0x19c   : > { %v473_v47 = vsel %vm343_vm0, %v465_v44, 0.0  ;;  %v482_v3 = vsel %vm343_vm0, %v470_v61, 0.0 }
 0x19d   : > { %v475_v50 = vadd.f32 %v474_v45, %v473_v47 }
 0x19f   : > { %v477_v54 = vadd.f32 %v476_v53, %v475_v50 }
 0x1a1   : > { %v448_v55 = vpop.permute.xlu1 %447  ;;  %v479_v60 = vadd.f32 %v478_v58, %v477_v54  ;;  %v463_v63 = vpop.permute.xlu2 %462  ;;  %v518_v58 = vld [vmem:[%s1709_s6 + $0x18] sm:$0xff] }
 0x1a2   : > { %v469_v56 = vmul.f32 %v448_v55, %v421_v51  ;;  %v472_v4 = vmul.f32 %v463_v63, %v424_v62 }
 0x1a4   : > { %v480_v59 = vsel %vm343_vm0, %v469_v56, 0.0  ;;  %v486_v9 = vsel %vm343_vm0, %v472_v4, 0.0 }
 0x1a5   : > { %v481_v0 = vadd.f32 %v480_v59, %v479_v60  ;;  %v529_v59 = vld [vmem:[%s1709_s6 + $0x70] sm:$0xff]  ;;  %v530_v60 = vld [vmem:[%s1709_s6 + $0x78] sm:$0xff] }
 0x1a7   : > { %v483_v6 = vadd.f32 %v482_v3, %v481_v0 }
 0x1a9   : > { %v458_v2 = vpop.permute.xlu1 %457 }
 0x1aa   : > { %v471_v5 = vmul.f32 %v458_v2, %v423_v1 }
 0x1ac   : > { %v484_v7 = vsel %vm343_vm0, %v471_v5, 0.0 }
 0x1ad   : > { %v485_v8 = vadd.f32 %v484_v7, %v483_v6 }
 0x1af   : > { %v487_v11 = vadd.f32 %v486_v9, %v485_v8 }
 0x1b1   : > { %v488_v13 = vrot.slane %v487_v11, 4 }
 0x1b3   : > { %v489_v14 = vadd.f32 %v488_v13, %v487_v11  ;;  %v519_v13 = vld [vmem:[%s1709_s6 + $0x20] sm:$0xff] }
 0x1b5   : > { %v490_v17 = vrot.slane %v489_v14, 2 }
 0x1b7   : > { %v491_v18 = vadd.f32 %v490_v17, %v489_v14  ;;  %v520_v14 = vld [vmem:[%s1709_s6 + $0x28] sm:$0xff] }
 0x1b9   : > { %v492_v19 = vrot.slane %v491_v18, 1 }
 0x1bb   : > { %v493_v23 = vadd.f32 %v492_v19, %v491_v18 }
 0x1bd   : > { %v495_v25 = vadd.f32 %v494_v22, %v493_v23  ;;  %v521_v22 = vld [vmem:[%s1709_s6 + $0x30] sm:$0xff]  ;;  %v522_v23 = vld [vmem:[%s1709_s6 + $0x38] sm:$0xff] }
 0x1bf   : > { %v1103_v10 = vmul.f32 -1.442695, %v495_v25 }
 0x1c1   : > { %1194 = vpow2.f32 %v1103_v10 }
 0x1c7   : > { %v1195_v27 = vpop.eup %1194 }
 0x1c8   : > { %v499_v12 = vadd.f32 1.0, %v1195_v27 }
 0x1ca   : > { %1196 = vrcp.f32 %v499_v12  ;;  %v511_v31 = vand.u32 2147483648, %v499_v12  ;;  %v509_v33 = vand.u32 2147483647, %v499_v12  ;;  %vm505_vm2 = vweird.f32 %v499_v12 }
 0x1cc   : > { %v512_v35 = vor.u32 1.1754944e-38, %v511_v31  ;;  %vm510_vm4 = vcmp.eq.f32.partialorder %v509_v33, 8.507059e+37 }
 0x1d0   : > { %v1197_v28 = vpop.eup %1196 }
 0x1d1   : > { %v501_v29 = vmul.f32 %v1197_v28, %v499_v12  ;;  %vm506_vm1 = vweird.f32 %v1197_v28 }
 0x1d2   : > { %vm507_vm3 = vmor %vm505_vm2, %vm506_vm1 }
 0x1d3   : > { %v502_v30 = vsub.f32 1.0, %v501_v29  ;;  %v523_v29 = vld [vmem:[%s1709_s6 + $0x40] sm:$0xff] }
 0x1d5   : > { %v503_v32 = vmul.f32 %v1197_v28, %v502_v30  ;;  %v524_v30 = vld [vmem:[%s1709_s6 + $0x48] sm:$0xff] }
 0x1d7   : > { %v504_v34 = vadd.f32 %v1197_v28, %v503_v32 }
 0x1d9   : > { %v508_v36 = vsel %vm507_vm3, %v1197_v28, %v504_v34 }
 0x1da   : > { %v513_v38 = vsel %vm510_vm4, %v512_v35, %v508_v36 }
 0x1db   : > { %v1534_v42 = vperm.slane %v513_v38, 0  ;;  %v525_v38 = vld [vmem:[%s1709_s6 + $0x50] sm:$0xff] }
 0x1dd   : > { %v532_v43 = vmul.f32 %v1534_v42, %v515_v37  ;;  %v533_v44 = vmul.f32 %v1534_v42, %v516_v39  ;;  %v544_v45 = vmul.f32 %v1534_v42, %v527_v40  ;;  %v545_v46 = vmul.f32 %v1534_v42, %v528_v41  ;;  %v526_v39 = vld [vmem:[%s1709_s6 + $0x58] sm:$0xff] }
 0x1de   : > { %v534_v61 = vmul.f32 %v1534_v42, %v517_v57  ;;  %v535_v62 = vmul.f32 %v1534_v42, %v518_v58  ;;  %v546_v63 = vmul.f32 %v1534_v42, %v529_v59  ;;  %v547_v0 = vmul.f32 %v1534_v42, %v530_v60 }
 0x1df   : > { %v548_v47 = vpack.c.bf16 %v532_v43, %v532_v43  ;;  %v549_v48 = vpack.c.bf16 %v533_v44, %v533_v44  ;;  %v560_v49 = vpack.c.bf16 %v544_v45, %v544_v45  ;;  %v561_v50 = vpack.c.bf16 %v545_v46, %v545_v46 }
 0x1e0   : > { %v550_v1 = vpack.c.bf16 %v534_v61, %v534_v61  ;;  %v551_v2 = vpack.c.bf16 %v535_v62, %v535_v62  ;;  %v562_v3 = vpack.c.bf16 %v546_v63, %v546_v63  ;;  %v563_v4 = vpack.c.bf16 %v547_v0, %v547_v0 }
 0x1e1   : > { %v582_v51 = vunpack.c.l.b16 %v548_v47  ;;  %v583_v52 = vunpack.c.l.b16 %v549_v48  ;;  %v594_v53 = vunpack.c.l.b16 %v560_v49  ;;  %v595_v54 = vunpack.c.l.b16 %v561_v50  ;;  %v1114_v48 = vld [vmem:[%s1363_s21] sm:$0xf]  ;;  %v1144_v49 = vld [vmem:[%s1363_s21 + $0x4] sm:$0xf0]  ;;  %v1143_v50 = vld [vmem:[%s1363_s21 + $0x4] sm:$0xf] }
 0x1e2   : > { %v584_v5 = vunpack.c.l.b16 %v550_v1  ;;  %v585_v6 = vunpack.c.l.b16 %v551_v2  ;;  %v596_v7 = vunpack.c.l.b16 %v562_v3  ;;  %v597_v8 = vunpack.c.l.b16 %v563_v4 }
 0x1e3   : > { %v598_v55 = vpack.c.b16 %v583_v52, %v582_v51  ;;  %v604_v56 = vpack.c.b16 %v595_v54, %v594_v53  ;;  %v536_v15 = vmul.f32 %v1534_v42, %v519_v13  ;;  %v537_v16 = vmul.f32 %v1534_v42, %v520_v14  ;;  %v1116_v52 = vld [vmem:[%s1363_s21 + $0x8] sm:$0xf0]  ;;  %s311_s21 = sand.u32 1, %s1252_s28  }
 0x1e4   : > { %v599_v9 = vpack.c.b16 %v585_v6, %v584_v5  ;;  %v605_v11 = vpack.c.b16 %v597_v8, %v596_v7  ;;  %v538_v24 = vmul.f32 %v1534_v42, %v521_v22  ;;  %v539_v25 = vmul.f32 %v1534_v42, %v522_v23  ;;  %s1098_s18 = sshll.u32 %s311_s21, 8  ;;  %s1005_s9 = scalar_lea.sflag [#allocation3], %s311_s21 }
 0x1e5   : > { %1104 = vmatmul.msk.bf16.vlgmr.msra.gmra.mxu0 %vm343_vm0, %v598_v55  ;;  %1110 = vmatmul.msk.bf16.vlgmr.msra.gmra.mxu3 %vm343_vm0, %v604_v56  ;;  %v552_v17 = vpack.c.bf16 %v536_v15, %v536_v15  ;;  %v553_v18 = vpack.c.bf16 %v537_v16, %v537_v16  ;;  %v540_v31 = vmul.f32 %v1534_v42, %v523_v29  ;;  %s1619_s19 = scalar_lea.vmem [#allocation2], %s1098_s18  ;;  %s1218_s18 = scalar_lea.hbm %s1711_s8, 512 }
 0x1e6   : > { %v554_v26 = vpack.c.bf16 %v538_v24, %v538_v24  ;;  %v555_v10 = vpack.c.bf16 %v539_v25, %v539_v25  ;;  %v541_v32 = vmul.f32 %v1534_v42, %v524_v30  ;;  %v542_v40 = vmul.f32 %v1534_v42, %v525_v38  ;;  %s1017_s25 = sshll.u32 %s1619_s19, 4  ;;  %p1220_p1 = scmp.lt.s32.totalorder %s1218_s18, %s1214_s12  ;;  %s1018_s25 = int_to_ptr.vmem [resolvable:$true] %s1017_s25 }
 0x1e7   : > { %v586_v19 = vunpack.c.l.b16 %v552_v17  ;;  %v587_v20 = vunpack.c.l.b16 %v553_v18  ;;  %v556_v33 = vpack.c.bf16 %v540_v31, %v540_v31  ;;  %v543_v41 = vmul.f32 %v1534_v42, %v526_v39 }
 0x1e8   : > { %v588_v27 = vunpack.c.l.b16 %v554_v26  ;;  %v589_v12 = vunpack.c.l.b16 %v555_v10  ;;  %v557_v34 = vpack.c.bf16 %v541_v32, %v541_v32  ;;  %v558_v43 = vpack.c.bf16 %v542_v40, %v542_v40  ;;  %p1221_p2 = por %p1220_p1, %p1219_p0 }
 0x1e9   : > { %v600_v21 = vpack.c.b16 %v587_v20, %v586_v19  ;;  %v590_v35 = vunpack.c.l.b16 %v556_v33  ;;  %v559_v44 = vpack.c.bf16 %v543_v41, %v543_v41  ;;  %v1115_v51 = vor.u32 %v1144_v49, %v1114_v48 }
 0x1ea   : > { %v601_v28 = vpack.c.b16 %v589_v12, %v588_v27  ;;  %v591_v36 = vunpack.c.l.b16 %v557_v34  ;;  %v592_v45 = vunpack.c.l.b16 %v558_v43  ;;  %v1119_v53 = vor.u32 %v1143_v50, %v1116_v52  ;;  %p1222_p3 = pnand %p1221_p2, %p1217_p13 }
 0x1eb   : > { %v593_v46 = vunpack.c.l.b16 %v559_v44  ;;  %881 = vmatpush.bf16.msra.mxu1 %v1115_v51  ;;  %1147 = vmatpush.bf16.msrb.mxu3 %v1115_v51 }
 0x1ec   : > { %v602_v37 = vpack.c.b16 %v591_v36, %v590_v35  ;;  %930 = vmatpush.bf16.msra.mxu2 %v1119_v53 }
 0x1ed   : > { %v603_v47 = vpack.c.b16 %v593_v46, %v592_v45  ;;  %v722_v46 = vpop.permute.xlu1 %721 }
 0x1ef   : > { %1148 = vmatpush.bf16.msra.mxu3 %v1119_v53 }
 0x1f5   : > { %1105 = vmatmul.msk.bf16.gmra.mxu0 %vm343_vm0, %v599_v9  ;;  %1111 = vmatmul.msk.bf16.gmra.mxu3 %vm343_vm0, %v605_v11  ;;  %v737_v48 = vpop.permute.xlu1 %736 }
 0x1fd   : > { %v752_v52 = vpop.permute.xlu1 %751 }
 0x205   : > { %1106 = vmatmul.msk.bf16.gmra.mxu0 %vm343_vm0, %v600_v21 }
 0x215   : > { %1107 = vmatmul.msk.bf16.gmra.mxu0 %vm343_vm0, %v601_v28 }
 0x225   : > { %1108 = vmatmul.msk.bf16.gmra.mxu0 %vm343_vm0, %v602_v37 }
 0x235   : > { %1109 = vmatmul.msk.bf16.gmra.mxu0 %vm343_vm0, %v603_v47  ;;  %v732_v47 = vpop.permute.xlu2 %731 }
 0x23d   : > { %v747_v49 = vpop.permute.xlu2 %746 }
 0x262   : > { %v647_v54 = vpop.f32.mrf.mxu0 }
 0x263   : > { %v687_v42 = vpack.c.bf16 %v647_v54, %v647_v54  ;;  %v727_v54 = vpop.permute.xlu0 %726 }
 0x265   : > { %v815_v58 = vunpack.c.l.b16 %v687_v42  ;;  %v1622_v42 = vpop.permute.xlu2 %761 }
 0x268   : > { %v677_v55 = vpop.f32.mrf.mxu3 }
 0x269   : > { %v699_v60 = vpack.c.bf16 %v677_v55, %v677_v55 }
 0x26a   : > { %v649_v56 = vpop.f32.mrf.mxu0 }
 0x26b   : > { %v688_v57 = vpack.c.bf16 %v649_v56, %v649_v56  ;;  %v827_v1 = vunpack.c.l.b16 %v699_v60  ;;  %v1626_v60 = vpop.permute.xlu1 %766 }
 0x26d   : > { %v816_v59 = vunpack.c.l.b16 %v688_v57 }
 0x26f   : > { %v831_v61 = vpack.c.b16 %v816_v59, %v815_v58 }
 0x270   : > { %v679_v62 = vpop.f32.mrf.mxu3 }
 0x271   : > { %v700_v63 = vpack.c.bf16 %v679_v62, %v679_v62  ;;  %1120 = vmatmul.msk.bf16.vlgmr.msra.gmra.mxu1 %vm849_vm5, %v831_v61  ;;  %1128 = vmatmul.msk.bf16.vlgmr.msra.gmra.mxu2 %vm849_vm5, %v831_v61 }
 0x272   : > { %v652_v0 = vpop.f32.mrf.mxu0 }
 0x273   : > { %v828_v2 = vunpack.c.l.b16 %v700_v63  ;;  %v689_v5 = vpack.c.bf16 %v652_v0, %v652_v0  ;;  %v1629_v63 = vpop.permute.xlu2 %776 }
 0x275   : > { %v837_v3 = vpack.c.b16 %v828_v2, %v827_v1  ;;  %v817_v8 = vunpack.c.l.b16 %v689_v5 }
 0x278   : > { %v682_v4 = vpop.f32.mrf.mxu3 }
 0x279   : > { %v701_v11 = vpack.c.bf16 %v682_v4, %v682_v4  ;;  %v1633_v4 = vpop.permute.xlu1 %781 }
 0x27a   : > { %v654_v6 = vpop.f32.mrf.mxu0 }
 0x27b   : > { %v690_v7 = vpack.c.bf16 %v654_v6, %v654_v6  ;;  %v829_v17 = vunpack.c.l.b16 %v701_v11  ;;  %v792_v5 = vpop.permute.xlu2 %791  ;;  %v742_v11 = vpop.permute.xlu0 %741 }
 0x27d   : > { %v818_v9 = vunpack.c.l.b16 %v690_v7 }
 0x27f   : > { %v832_v13 = vpack.c.b16 %v818_v9, %v817_v8 }
 0x280   : > { %v684_v14 = vpop.f32.mrf.mxu3 }
 0x281   : > { %v702_v15 = vpack.c.bf16 %v684_v14, %v684_v14  ;;  %1121 = vmatmul.msk.bf16.gmra.mxu1 %vm849_vm5, %v832_v13  ;;  %1129 = vmatmul.msk.bf16.gmra.mxu2 %vm849_vm5, %v832_v13 }
 0x282   : > { %v657_v16 = vpop.f32.mrf.mxu0 }
 0x283   : > { %v830_v18 = vunpack.c.l.b16 %v702_v15  ;;  %v691_v20 = vpack.c.bf16 %v657_v16, %v657_v16  ;;  %v797_v15 = vpop.permute.xlu1 %796 }
 0x285   : > { %v838_v19 = vpack.c.b16 %v830_v18, %v829_v17  ;;  %v819_v23 = vunpack.c.l.b16 %v691_v20 }
 0x287   : > { %1127 = vmatmul.msk.bf16.vlgmr.msrb.gmra.mxu3 %vm849_vm5, %v838_v19 }
 0x28a   : > { %v659_v21 = vpop.f32.mrf.mxu0 }
 0x28b   : > { %v692_v22 = vpack.c.bf16 %v659_v21, %v659_v21 }
 0x28d   : > { %v820_v24 = vunpack.c.l.b16 %v692_v22 }
 0x28f   : > { %v833_v25 = vpack.c.b16 %v820_v24, %v819_v23 }
 0x291   : > { %1122 = vmatmul.msk.bf16.gmra.mxu1 %vm849_vm5, %v833_v25  ;;  %1130 = vmatmul.msk.bf16.gmra.mxu2 %vm849_vm5, %v833_v25 }
 0x292   : > { %v662_v26 = vpop.f32.mrf.mxu0 }
 0x293   : > { %v693_v10 = vpack.c.bf16 %v662_v26, %v662_v26 }
 0x295   : > { %v821_v28 = vunpack.c.l.b16 %v693_v10 }
 0x297   : > { %1135 = vmatmul.msk.bf16.vlgmr.msra.gmra.mxu3 %vm849_vm5, %v838_v19 }
 0x29a   : > { %v664_v27 = vpop.f32.mrf.mxu0 }
 0x29b   : > { %v694_v12 = vpack.c.bf16 %v664_v27, %v664_v27 }
 0x29d   : > { %v822_v29 = vunpack.c.l.b16 %v694_v12 }
 0x29f   : > { %v834_v30 = vpack.c.b16 %v822_v29, %v821_v28 }
 0x2a1   : > { %1123 = vmatmul.msk.bf16.gmra.mxu1 %vm849_vm5, %v834_v30  ;;  %1131 = vmatmul.msk.bf16.gmra.mxu2 %vm849_vm5, %v834_v30  ;;  %v757_v30 = vpop.permute.xlu0 %756 }
 0x2a2   : > { %v667_v31 = vpop.f32.mrf.mxu0 }
 0x2a3   : > { %v695_v32 = vpack.c.bf16 %v667_v31, %v667_v31 }
 0x2a5   : > { %v823_v35 = vunpack.c.l.b16 %v695_v32 }
 0x2aa   : > { %v669_v33 = vpop.f32.mrf.mxu0 }
 0x2ab   : > { %v696_v34 = vpack.c.bf16 %v669_v33, %v669_v33 }
 0x2ad   : > { %v824_v36 = vunpack.c.l.b16 %v696_v34 }
 0x2af   : > { %v835_v37 = vpack.c.b16 %v824_v36, %v823_v35 }
 0x2b1   : > { %1124 = vmatmul.msk.bf16.gmra.mxu1 %vm849_vm5, %v835_v37  ;;  %1132 = vmatmul.msk.bf16.gmra.mxu2 %vm849_vm5, %v835_v37 }
 0x2b2   : > { %v672_v38 = vpop.f32.mrf.mxu0 }
 0x2b3   : > { %v697_v39 = vpack.c.bf16 %v672_v38, %v672_v38 }
 0x2b5   : > { %v825_v43 = vunpack.c.l.b16 %v697_v39 }
 0x2ba   : > { %v674_v40 = vpop.f32.mrf.mxu0 }
 0x2bb   : > { %v698_v41 = vpack.c.bf16 %v674_v40, %v674_v40 }
 0x2bd   : > { %v826_v44 = vunpack.c.l.b16 %v698_v41 }
 0x2bf   : > { %v836_v45 = vpack.c.b16 %v826_v44, %v825_v43  ;;  %v772_v44 = vpop.permute.xlu0 %771 }
 0x2c1   : > { %1125 = vmatmul.msk.bf16.gmra.mxu1 %vm849_vm5, %v836_v45  ;;  %1133 = vmatmul.msk.bf16.gmra.mxu2 %vm849_vm5, %v836_v45 }
 0x2d1   : > { %1126 = vmatmul.msk.bf16.gmra.mxu1 %vm849_vm5, %v837_v3  ;;  %1134 = vmatmul.msk.bf16.gmra.mxu2 %vm849_vm5, %v837_v3 }
 0x2ee   : > { %v883_v50 = vpop.f32.mrf.mxu1 }
 0x2ef   : > { %v884_v51 = vadd.f32 %v883_v50, %v722_v46 }
 0x2f1   : > { %972 = vst [vmem:[%s1619_s19] sm:$0xff] %v884_v51 }
 0x2f4   : > { %v932_v53 = vpop.f32.mrf.mxu2 }
 0x2f5   : > { %v933_v55 = vadd.f32 %v932_v53, %v722_v46 }
 0x2f6   : > { %v885_v56 = vpop.f32.mrf.mxu1 }
 0x2f7   : > { %973 = vst [vmem:[%s1619_s19 + $0x8] sm:$0xff] %v933_v55  ;;  %v886_v57 = vadd.f32 %v885_v56, %v727_v54  ;;  %v787_v56 = vpop.permute.xlu0 %786 }
 0x2f9   : > { %974 = vst [vmem:[%s1619_s19 + $0x10] sm:$0xff] %v886_v57 }
 0x2fc   : > { %v934_v58 = vpop.f32.mrf.mxu2 }
 0x2fd   : > { %v935_v59 = vadd.f32 %v934_v58, %v727_v54 }
 0x2fe   : > { %v888_v61 = vpop.f32.mrf.mxu1 }
 0x2ff   : > { %975 = vst [vmem:[%s1619_s19 + $0x18] sm:$0xff] %v935_v59  ;;  %v889_v62 = vadd.f32 %v888_v61, %v732_v47 }
 0x301   : > { %976 = vst [vmem:[%s1619_s19 + $0x20] sm:$0xff] %v889_v62 }
 0x304   : > { %v937_v0 = vpop.f32.mrf.mxu2 }
 0x305   : > { %v938_v1 = vadd.f32 %v937_v0, %v732_v47 }
 0x306   : > { %v890_v2 = vpop.f32.mrf.mxu1 }
 0x307   : > { %977 = vst [vmem:[%s1619_s19 + $0x28] sm:$0xff] %v938_v1  ;;  %v891_v3 = vadd.f32 %v890_v2, %v737_v48 }
 0x309   : > { %978 = vst [vmem:[%s1619_s19 + $0x30] sm:$0xff] %v891_v3 }
 0x30a   : > { %v918_v6 = vpop.f32.mrf.mxu3 }
 0x30b   : > { %v919_v7 = vadd.f32 %v918_v6, %v792_v5 }
 0x30c   : > { %v939_v8 = vpop.f32.mrf.mxu2 }
 0x30d   : > { %1000 = vst [vmem:[%s1619_s19 + $0xe0] sm:$0xff] %v919_v7  ;;  %v940_v9 = vadd.f32 %v939_v8, %v737_v48 }
 0x30e   : > { %v893_v13 = vpop.f32.mrf.mxu1 }
 0x30f   : > { %979 = vst [vmem:[%s1619_s19 + $0x38] sm:$0xff] %v940_v9  ;;  %v894_v14 = vadd.f32 %v893_v13, %v742_v11 }
 0x311   : > { %980 = vst [vmem:[%s1619_s19 + $0x40] sm:$0xff] %v894_v14 }
 0x312   : > { %v920_v16 = vpop.f32.mrf.mxu3 }
 0x313   : > { %v921_v17 = vadd.f32 %v920_v16, %v797_v15 }
 0x314   : > { %v942_v18 = vpop.f32.mrf.mxu2 }
 0x315   : > { %1002 = vst [vmem:[%s1619_s19 + $0xf0] sm:$0xff] %v921_v17  ;;  %v943_v19 = vadd.f32 %v942_v18, %v742_v11 }
 0x316   : > { %v895_v20 = vpop.f32.mrf.mxu1 }
 0x317   : > { %981 = vst [vmem:[%s1619_s19 + $0x48] sm:$0xff] %v943_v19  ;;  %v896_v21 = vadd.f32 %v895_v20, %v747_v49 }
 0x319   : > { %982 = vst [vmem:[%s1619_s19 + $0x50] sm:$0xff] %v896_v21 }
 0x31a   : > { %v967_v22 = vpop.f32.mrf.mxu3 }
 0x31b   : > { %v968_v23 = vadd.f32 %v967_v22, %v792_v5 }
 0x31c   : > { %v944_v24 = vpop.f32.mrf.mxu2 }
 0x31d   : > { %1001 = vst [vmem:[%s1619_s19 + $0xe8] sm:$0xff] %v968_v23  ;;  %v945_v25 = vadd.f32 %v944_v24, %v747_v49 }
 0x31e   : > { %v898_v26 = vpop.f32.mrf.mxu1 }
 0x31f   : > { %983 = vst [vmem:[%s1619_s19 + $0x58] sm:$0xff] %v945_v25  ;;  %v899_v10 = vadd.f32 %v898_v26, %v752_v52 }
 0x321   : > { %984 = vst [vmem:[%s1619_s19 + $0x60] sm:$0xff] %v899_v10 }
 0x322   : > { %v969_v27 = vpop.f32.mrf.mxu3 }
 0x323   : > { %v970_v12 = vadd.f32 %v969_v27, %v797_v15 }
 0x324   : > { %v947_v28 = vpop.f32.mrf.mxu2 }
 0x325   : > { %1003 = vst [vmem:[%s1619_s19 + $0xf8] sm:$0xff] %v970_v12  ;;  %v948_v29 = vadd.f32 %v947_v28, %v752_v52 }
 0x326   : > { %v900_v31 = vpop.f32.mrf.mxu1 }
 0x327   : > { %985 = vst [vmem:[%s1619_s19 + $0x68] sm:$0xff] %v948_v29  ;;  %v901_v32 = vadd.f32 %v900_v31, %v757_v30 }
 0x329   : > { %986 = vst [vmem:[%s1619_s19 + $0x70] sm:$0xff] %v901_v32 }
 0x32c   : > { %v949_v33 = vpop.f32.mrf.mxu2 }
 0x32d   : > { %v950_v34 = vadd.f32 %v949_v33, %v757_v30 }
 0x32e   : > { %v903_v35 = vpop.f32.mrf.mxu1 }
 0x32f   : > { %987 = vst [vmem:[%s1619_s19 + $0x78] sm:$0xff] %v950_v34  ;;  %v904_v36 = vadd.f32 %v903_v35, %v1622_v42 }
 0x331   : > { %988 = vst [vmem:[%s1619_s19 + $0x80] sm:$0xff] %v904_v36 }
 0x334   : > { %v952_v37 = vpop.f32.mrf.mxu2 }
 0x335   : > { %v953_v38 = vadd.f32 %v952_v37, %v1622_v42 }
 0x336   : > { %v905_v39 = vpop.f32.mrf.mxu1 }
 0x337   : > { %989 = vst [vmem:[%s1619_s19 + $0x88] sm:$0xff] %v953_v38  ;;  %v906_v40 = vadd.f32 %v905_v39, %v1626_v60 }
 0x339   : > { %990 = vst [vmem:[%s1619_s19 + $0x90] sm:$0xff] %v906_v40 }
 0x33c   : > { %v954_v41 = vpop.f32.mrf.mxu2 }
 0x33d   : > { %v955_v43 = vadd.f32 %v954_v41, %v1626_v60 }
 0x33e   : > { %v908_v45 = vpop.f32.mrf.mxu1 }
 0x33f   : > { %991 = vst [vmem:[%s1619_s19 + $0x98] sm:$0xff] %v955_v43  ;;  %v909_v46 = vadd.f32 %v908_v45, %v772_v44 }
 0x341   : > { %992 = vst [vmem:[%s1619_s19 + $0xa0] sm:$0xff] %v909_v46 }
 0x344   : > { %v957_v47 = vpop.f32.mrf.mxu2 }
 0x345   : > { %v958_v48 = vadd.f32 %v957_v47, %v772_v44 }
 0x346   : > { %v910_v49 = vpop.f32.mrf.mxu1 }
 0x347   : > { %993 = vst [vmem:[%s1619_s19 + $0xa8] sm:$0xff] %v958_v48  ;;  %v911_v50 = vadd.f32 %v910_v49, %v1629_v63 }
 0x349   : > { %994 = vst [vmem:[%s1619_s19 + $0xb0] sm:$0xff] %v911_v50 }
 0x34c   : > { %v959_v51 = vpop.f32.mrf.mxu2 }
 0x34d   : > { %v960_v52 = vadd.f32 %v959_v51, %v1629_v63 }
 0x34e   : > { %v913_v53 = vpop.f32.mrf.mxu1 }
 0x34f   : > { %995 = vst [vmem:[%s1619_s19 + $0xb8] sm:$0xff] %v960_v52  ;;  %v914_v54 = vadd.f32 %v913_v53, %v1633_v4 }
 0x351   : > { %996 = vst [vmem:[%s1619_s19 + $0xc0] sm:$0xff] %v914_v54 }
 0x354   : > { %v962_v55 = vpop.f32.mrf.mxu2 }
 0x355   : > { %v963_v42 = vadd.f32 %v962_v55, %v1633_v4 }
 0x356   : > { %v915_v57 = vpop.f32.mrf.mxu1 }
 0x357   : > { %997 = vst [vmem:[%s1619_s19 + $0xc8] sm:$0xff] %v963_v42  ;;  %v916_v58 = vadd.f32 %v915_v57, %v787_v56 }
 0x359   : > { %998 = vst [vmem:[%s1619_s19 + $0xd0] sm:$0xff] %v916_v58 }
 0x35c   : > { %v964_v59 = vpop.f32.mrf.mxu2 }
 0x35d   : > { %v965_v60 = vadd.f32 %v964_v59, %v787_v56 }
 0x35f   : > { %999 = vst [vmem:[%s1619_s19 + $0xd8] sm:$0xff] %v965_v60 }
 0x360   : > { %1225 = shalt.err (!%p1222_p3)
}
 0x361   : > { %s1263_s21 = smov 256   ;;  %s1264_s19 = smov 16  }
 0x362   : > { %1149 = dma.vmem_to_hbm [thread:$0]  (%p1348_p5), %s1018_s25, 4096, %s1020_s26, %s1005_s9, %s1263_s21, %s1263_s21, %s1264_s19  }
 0x363 PF: > { %p1155_p4 = scmp.ge.s32.totalorder %s1260_s30, 2  ;;  %s1034_s23 = sand.u32 1, %s1248_s27  }
 0x364   : > { %s1035_s24 = scalar_lea.sflag [#allocation3], %s1034_s23 }
 0x365   : > { %p1152_p7 = pnand %p1155_p4, %p1352_p6 }
 0x367   : > { %p1153_p8 = pneg %p1152_p7 }
 0x369   : > { %1243 = dma.done.wait (%p1153_p8), %s1035_s24, 4096  }
 0x36a   : > { %1245 = vsyncadd (%p1153_p8), %s1035_s24, 4294963200  ;;  %p18_p9 = scmp.ge.s32.totalorder %s1335_s11, 4   ;;  %s1714_s27 = smov %s1252_s28 }
 0x36b   : > { %s1715_s28 = smov %s1256_s29  ;;  %s1716_s29 = smov %s1346_s14 }
 0x36c   : > { %s1717_s30 = smov %s1335_s11  ;;  %20 = sbr.rel (!%p18_p9) target bundleno = 3 (0x3), region = 90 }
 0x371   :  { %1041 = vsyncpa [#allocation3], 1 }
 0x372   :  { %1043 = vsyncpa [#allocation3 + $0x1], 1 }

</bundles_post_ra>
